<compile_context>
chip_gen: v6e
topology: v6e:2x2x1
jax: 0.10.0
libtpu: 0.0.40
codegen_flags: <defaults>
</compile_context>

<pallas_src>
import jax
import jax.numpy as jnp
from jax.experimental import pallas as pl
from jax.experimental.pallas import tpu as pltpu

# Shapes are static under jit, so these branch decisions resolve at trace time.
NO_GRID_MAX_ROWS = 8192    # whole problem in VMEM: <= 8192 * 80 B ~ 0.6 MiB
MAX_BLOCK_ROWS = 65536     # per-block cap for tiled path (~10 MiB double-buffered)


def linear_kernel(x_ref, w_ref, b_ref, o_ref):
    # x_ref: (B_blk, IN), w_ref: (IN, OUT), b_ref: (1, OUT), o_ref: (B_blk, OUT)
    acc = jnp.dot(x_ref[...], w_ref[...], preferred_element_type=jnp.float32)
    o_ref[...] = (acc + b_ref[...]).astype(o_ref.dtype)


def prepare_params(weight, bias):
    """One-time prep outside the hot path.

    weight: (OUT, IN) PyTorch layout -> (IN, OUT); bias: (OUT,) -> (1, OUT).
    """
    return jnp.asarray(weight).T, jnp.asarray(bias).reshape(1, -1)


def _round_up(x, m):
    return ((x + m - 1) // m) * m


@jax.jit
def linear_forward(x, w_t, b_row):
    """x: (B, IN) f32; w_t: (IN, OUT) f32; b_row: (1, OUT) f32 -> (B, OUT)."""
    B, in_f = x.shape
    out_f = w_t.shape[1]

    if B <= NO_GRID_MAX_ROWS:
        # Small / moderate batch: single invocation, no grid, everything
        # resident in VMEM.  One DMA each way, zero per-step pipeline cost.
        return pl.pallas_call(
            linear_kernel,
            out_shape=jax.ShapeDtypeStruct((B, out_f), x.dtype),
            in_specs=[
                pl.BlockSpec(memory_space=pltpu.MemorySpace.VMEM),
                pl.BlockSpec(memory_space=pltpu.MemorySpace.VMEM),
                pl.BlockSpec(memory_space=pltpu.MemorySpace.VMEM),
            ],
            out_specs=pl.BlockSpec(memory_space=pltpu.MemorySpace.VMEM),
        )(x, w_t, b_row)

    # Large batch: tile the batch dim with the minimum number of blocks.
    #   - 2 blocks => one per v7x TensorCore (dimension_semantics "parallel"),
    #     and only one extra (~0.35 us) pipeline step on single-TC v5e/v6e.
    #   - more blocks only if a single block would exceed the VMEM budget.
    # Per-block f32 footprint, double-buffered: block_b * (40 + 40) * 2 bytes.
    num_blocks = max(2, pl.cdiv(B, MAX_BLOCK_ROWS))
    block_b = _round_up(pl.cdiv(B, num_blocks), 8)
    grid = (pl.cdiv(B, block_b),)  # handles ragged B via a partial last block

    return pl.pallas_call(
        linear_kernel,
        out_shape=jax.ShapeDtypeStruct((B, out_f), x.dtype),
        grid=grid,
        in_specs=[
            pl.BlockSpec((block_b, in_f), lambda i: (i, 0)),
            pl.BlockSpec((in_f, out_f), lambda i: (0, 0)),   # weight resident
            pl.BlockSpec((1, out_f), lambda i: (0, 0)),      # bias resident
        ],
        out_specs=pl.BlockSpec((block_b, out_f), lambda i: (i, 0)),
        compiler_params=pltpu.CompilerParams(
            dimension_semantics=("parallel",),  # v7x: shard batch over 2 TCs
        ),
    )(x, w_t, b_row)


if __name__ == "__main__":
    key = jax.random.PRNGKey(0)
    k_w, k_b, k_x1, k_x2, k_x3 = jax.random.split(key, 5)

    IN_F, OUT_F = 10, 10

    # nn.Linear default init: U(-1/sqrt(fan_in), 1/sqrt(fan_in))
    bound = 1.0 / jnp.sqrt(jnp.float32(IN_F))
    weight = jax.random.uniform(k_w, (OUT_F, IN_F), jnp.float32, -bound, bound)
    bias = jax.random.uniform(k_b, (OUT_F,), jnp.float32, -bound, bound)

    # One-time parameter prep (transpose), outside the hot path.
    w_t, b_row = prepare_params(weight, bias)

    # --- small batch (matches module usage): no-grid VMEM path --------------
    x_small = jax.random.normal(k_x1, (8, IN_F), jnp.float32)
    out_small = jax.block_until_ready(linear_forward(x_small, w_t, b_row))
    assert out_small.shape == (8, OUT_F)
    ref_small = x_small @ weight.T + bias
    assert jnp.allclose(out_small, ref_small, atol=1e-5, rtol=1e-5), \
        "small-batch mismatch vs reference"

    # --- large even batch: tiled path, 2 'parallel' blocks ------------------
    x_big = jax.random.normal(k_x2, (16384, IN_F), jnp.float32)
    out_big = jax.block_until_ready(linear_forward(x_big, w_t, b_row))
    ref_big = x_big @ weight.T + bias
    assert jnp.allclose(out_big, ref_big, atol=1e-5, rtol=1e-5), \
        "large-batch mismatch vs reference"

    # --- ragged large batch: tiled path with a partial last block -----------
    x_rag = jax.random.normal(k_x3, (10004, IN_F), jnp.float32)
    out_rag = jax.block_until_ready(linear_forward(x_rag, w_t, b_row))
    ref_rag = x_rag @ weight.T + bias
    assert jnp.allclose(out_rag, ref_rag, atol=1e-5, rtol=1e-5), \
        "ragged-batch mismatch vs reference"

    print("KERNEL_OK")
</pallas_src>

<mosaic_0001>
module attributes {stable_mosaic.version = 11 : i64} {
  func.func @linear_kernel(%arg0: memref<8x10xf32, #tpu.memory_space<vmem>>, %arg1: memref<10x10xf32, #tpu.memory_space<vmem>>, %arg2: memref<1x10xf32, #tpu.memory_space<vmem>>, %arg3: memref<8x10xf32, #tpu.memory_space<vmem>>) attributes {dimension_semantics = [], scalar_prefetch = 0 : i64, scratch_operands = 0 : i64, tpu.core_type = #tpu.core_type<tc>} {
    %c0 = arith.constant 0 : index
    %c0_0 = arith.constant 0 : index
    %0 = vector.load %arg0[%c0, %c0_0] : memref<8x10xf32, #tpu.memory_space<vmem>>, vector<8x10xf32>
    %c0_1 = arith.constant 0 : index
    %c0_2 = arith.constant 0 : index
    %1 = vector.load %arg1[%c0_1, %c0_2] : memref<10x10xf32, #tpu.memory_space<vmem>>, vector<10x10xf32>
    %cst = arith.constant dense<0.000000e+00> : vector<8x10xf32>
    %2 = tpu.matmul %0, %1, %cst {dimension_numbers = #tpu.dot_dimension_numbers<[1], [0], [0], [1], [0, 0, 1, 1], [], []>} : vector<8x10xf32>, vector<10x10xf32>, vector<8x10xf32> -> vector<8x10xf32>
    %c0_3 = arith.constant 0 : index
    %c0_4 = arith.constant 0 : index
    %3 = vector.load %arg2[%c0_3, %c0_4] : memref<1x10xf32, #tpu.memory_space<vmem>>, vector<1x10xf32>
    %4 = vector.broadcast %3 : vector<1x10xf32> to vector<8x10xf32>
    %5 = arith.addf %2, %4 : vector<8x10xf32>
    %c0_5 = arith.constant 0 : index
    %c0_6 = arith.constant 0 : index
    %6 = vector.load %arg3[%c0_5, %c0_6] : memref<8x10xf32, #tpu.memory_space<vmem>>, vector<8x10xf32>
    tpu.vector_store %arg3[%c0_5, %c0_6], %5 {strides = array<i32>} : memref<8x10xf32, #tpu.memory_space<vmem>>, vector<8x10xf32>,
    return
  }
}

</mosaic_0001>

<bundles_post_ra>
// kernel: linear_forward.1
= control target key start
LH: loop header
LB: loop body
LE: loop exit
PB: predicated region body
PF: predicated region fallthrough
CT: control target
= control target key end

     0   :  { %8 = vsyncpa [#allocation3], 0  ;;  %s271_s0 = inlined_call_operand.hbm [shape: f32[8,10], index: 0, kind: input, shape index: {}]   ;;  %s272_s1 = inlined_call_operand.hbm [shape: f32[10,10], index: 1, kind: input, shape index: {}]   ;;  %s273_s2 = inlined_call_operand.vmem [shape: f32[1,10], index: 2, kind: input, shape index: {}]   ;;  %s274_s3 = inlined_call_operand.hbm [shape: f32[8,10], index: 3, kind: output, shape index: {}]  }
   0x1   :  { %9 = vsyncpa [#allocation6], 0 }
   0x2   :  { %10 = vsyncpa [#allocation4], 0  ;;  %s232_s12 = smov [#allocation2]   ;;  %s233_s14 = smov [#allocation5]  }
   0x3   :  { %s17_s13 = sshll.u32 %s232_s12, 4  ;;  %s26_s15 = sshll.u32 %s233_s14, 4  ;;  %s18_s13 = int_to_ptr.vmem [resolvable:$true] %s17_s13  ;;  %s27_s15 = int_to_ptr.vmem [resolvable:$true] %s26_s15 }
   0x4   :  { %s174_s16 = scalar_lea.vmem %s18_s13, 128  ;;  %p179_p1 = scmp.lt.s32.totalorder %s18_s13, %s18_s13 }
   0x5   :  { %p175_p0 = scmp.ne.s32.totalorder %s18_s13, %s174_s16  ;;  %p180_p2 = scmp.lt.s32.totalorder %s174_s16, %s174_s16 }
   0x7   :  { %p181_p3 = por %p180_p2, %p179_p1 }
   0x9   :  { %p182_p4 = pnand %p181_p3, %p175_p0 }
   0xb   :  { %185 = shalt.err (!%p182_p4)
}
   0xc   :  { %20 = dma.hbm_to_vmem [thread:$0]  %s271_s0, 128, %s18_s13, [#allocation3]  }
   0xd   :  { %s194_s19 = scalar_lea.vmem %s27_s15, 256  ;;  %p199_p6 = scmp.lt.s32.totalorder %s27_s15, %s27_s15 }
   0xe   :  { %p195_p5 = scmp.ne.s32.totalorder %s27_s15, %s194_s19  ;;  %p200_p7 = scmp.lt.s32.totalorder %s194_s19, %s194_s19 }
  0x10   :  { %p201_p8 = por %p200_p7, %p199_p6 }
  0x12   :  { %p202_p9 = pnand %p201_p8, %p195_p5 }
  0x14   :  { %205 = shalt.err (!%p202_p9)
}
  0x15   :  { %s234_s20 = smov 128   ;;  %s235_s21 = smov 8  }
  0x16   :  { %32 = dma.hbm_to_vmem [thread:$0]  %s272_s1, 256, %s27_s15, [#allocation6], %s234_s20, %s234_s20, %s235_s21  }
  0x17   :  { %226 = dma.done.wait [#allocation3], 128  }
  0x18   :  { %227 = vsyncadd [#allocation3], 4294967168 }
  0x19   :  { %228 = dma.done.wait [#allocation6], 256  }
  0x1a   :  { %229 = vsyncadd [#allocation6], 4294967040  ;;  %v236_v0 = vmov 0.0   ;;  %vm237_vm0 = vmmov 0   ;;  %vm55_vm1 = vcmask 1041408   ;;  %v42_v2 = vld [vmem:[#allocation5] sm:$0xff] }
  0x1b   :  { %152 = vmatprep.subr.mxu0 %v236_v0  ;;  %156 = vmatprep.mubr.msk.f32.mxu0 %vm237_vm0, %v236_v0  ;;  %v43_v1 = vld [vmem:[#allocation5 + $0x8] sm:$0x3]  ;;  %v41_v3 = vld [vmem:[#allocation2] sm:$0xff]  ;;  %vm51_vm2 = vcmask 80896   ;;  %s238_s1 = smov [#allocation7]  }
  0x1c   :  { %153 = vmatpush3.msk.msra.mxu0 %vm55_vm1, %v43_v1  ;;  %v146_v4 = vld [vmem:[%s273_s2] ss:$0 sm:$0xff]  ;;  %s136_s25 = sshll.u32 %s238_s1, 4  ;;  %s137_s25 = int_to_ptr.vmem [resolvable:$true] %s136_s25 }
  0x1d   :  { %154 = vmatprep.subr.mxu0 %v236_v0  ;;  %s206_s26 = scalar_lea.vmem %s137_s25, 128  ;;  %p211_p11 = scmp.lt.s32.totalorder %s137_s25, %s137_s25 }
  0x1e   :  { %155 = vmatpush3.msra.mxu0 %v42_v2  ;;  %p207_p10 = scmp.ne.s32.totalorder %s137_s25, %s206_s26  ;;  %p212_p12 = scmp.lt.s32.totalorder %s206_s26, %s206_s26 }
  0x1f   :  { %157 = vmatmul.mubr.msk.f32.vlgmr.msra.gmra.mxu0 %vm51_vm2, %v41_v3 }
  0x20   :  { %p213_p13 = por %p212_p12, %p211_p11 }
  0x22   :  { %p214_p0 = pnand %p213_p13, %p207_p10 }
  0xdf   :  { %v125_v5 = vpop.f32.mrf.mxu0 }
  0xe0   :  { %v126_v6 = vadd.f32 %v146_v4, %v125_v5 }
  0xe1   :  { %v158_v7 = vpop.f32.mrf.mxu0 }
  0xe2   :  { %129 = vst.msk [vmem:[#allocation7] sm:$0xff] %vm51_vm2, %v126_v6 }
  0xe3   :  { %217 = shalt.err (!%p214_p0)
}
  0xe4   :  { %139 = dma.vmem_to_hbm [thread:$0]  %s137_s25, 128, %s274_s3, [#allocation4]  }
  0xe5   :  { %230 = dma.done.wait [#allocation4], 128  }
  0xe6   :  { %231 = vsyncadd [#allocation4], 4294967168 }
  0xe7   :  { %143 = vsyncpa [#allocation3], 1 }
  0xe8   :  { %144 = vsyncpa [#allocation6], 1 }
  0xe9   :  { %145 = vsyncpa [#allocation4], 1 }

</bundles_post_ra>
